<compile_context>
chip_gen: v5e
topology: v5e:2x2
jax: 0.10.0
libtpu: 0.0.40
codegen_flags: <defaults>
</compile_context>

<pallas_src>
import jax
import jax.numpy as jnp
from jax import lax
from jax.experimental import pallas as pl
from jax.experimental.pallas import tpu as pltpu


def _decode_kernel(tok_ref,                                   # (T, B) int32 SMEM (scalar prefetch)
                   emb_ref, h0_ref, c0_ref,                   # (V,E), (B,H), (B,H)
                   eproj_ref, enc_ref, abias_ref,             # (B,S*H), (B,S*H), (B,S)
                   vblk_ref, expR_ref, gsum_ref,              # (S*H,S), (S,S*H), (S*H,H)
                   wh_ref, wih_ref, bg_ref,                   # (H,5H), (H+E,4H), (1,4H)
                   wout_ref, bout_ref,                        # (H,V), (1,V)
                   logp_ref, hout_ref, cout_ref,              # (1,B,V), (B,H), (B,H)
                   h_st, c_st):                               # VMEM scratch (B,H) x2
    t = pl.program_id(0)
    B, H = h_st.shape
    V, E = emb_ref.shape
    S = abias_ref.shape[1]

    # ---- initialize the carried hidden state on the first decode step -------
    @pl.when(t == 0)
    def _():
        h_st[...] = h0_ref[...]
        c_st[...] = c0_ref[...]

    # ---- in-kernel embedding gather (tokens in SMEM, table VMEM-resident) ----
    # one-hot (B, V) built from scalar token ids, gathered with one MXU push.
    col_ids = lax.broadcasted_iota(jnp.int32, (B, V), 1)
    row_ids = lax.broadcasted_iota(jnp.int32, (B, V), 0)
    tok_mat = jnp.zeros((B, V), jnp.int32)
    for b in range(B):
        tok_mat = jnp.where(row_ids == b, tok_ref[t, b], tok_mat)
    onehot = (col_ids == tok_mat).astype(jnp.float32)
    emb = jnp.dot(onehot, emb_ref[...], preferred_element_type=jnp.float32)   # (B, E)

    h0 = h_st[...]
    c0 = c_st[...]

    # ---- single MXU push for both matmuls sharing h0: [w_hh | wa_h] ---------
    h_fused = jnp.dot(h0, wh_ref[...], preferred_element_type=jnp.float32)    # (B, 5H)
    hh_gates = h_fused[:, :4 * H]                                             # (B, 4H)
    h_proj = h_fused[:, 4 * H:]                                               # (B, H)

    # ---- attention, lane-dense batch-major (B, S*H) --------------------------
    h_proj_t = jnp.concatenate([h_proj] * S, axis=1)                          # (B, S*H)
    energy = jnp.tanh(eproj_ref[...] + h_proj_t)                              # (B, S*H)
    # v() score via block-diag(v): (B, S*H) @ (S*H, S) -> (B, S), no reshapes.
    score = jnp.dot(energy, vblk_ref[...], preferred_element_type=jnp.float32)
    logits = score + abias_ref[...]          # v bias + (-1e5 * pad) folded in wrapper
    m = jnp.max(logits, axis=1, keepdims=True)                                # softmax over S
    p = jnp.exp(logits - m)
    attn_w = p * pl.reciprocal(jnp.sum(p, axis=1, keepdims=True), approx=True)  # (B, S)
    # expand attn weights across each H-lane group and reduce over S, both on MXU
    attn_exp = jnp.dot(attn_w, expR_ref[...], preferred_element_type=jnp.float32)   # (B, S*H)
    context = jnp.dot(attn_exp * enc_ref[...], gsum_ref[...],
                      preferred_element_type=jnp.float32)                     # (B, H)

    # ---- LSTM single step: one K=(H+E) push on [context | emb] --------------
    rnn_in = jnp.concatenate([context, emb], axis=1)                          # (B, H+E)
    gates = (jnp.dot(rnn_in, wih_ref[...], preferred_element_type=jnp.float32)
             + hh_gates + bg_ref[...])                                        # (B, 4H)
    sig = jax.nn.sigmoid(gates)               # one full-width EUP pass
    th = jnp.tanh(gates)                      # one full-width EUP pass
    i_g = sig[:, 0 * H:1 * H]
    f_g = sig[:, 1 * H:2 * H]
    g_g = th[:, 2 * H:3 * H]
    o_g = sig[:, 3 * H:4 * H]
    c1 = f_g * c0 + i_g * g_g
    h1 = o_g * jnp.tanh(c1)
    h_st[...] = h1
    c_st[...] = c1

    # ---- output projection + log_softmax -------------------------------------
    out_logits = (jnp.dot(h1, wout_ref[...], preferred_element_type=jnp.float32)
                  + bout_ref[...])                                            # (B, V)
    m2 = jnp.max(out_logits, axis=-1, keepdims=True)
    lse = m2 + jnp.log(jnp.sum(jnp.exp(out_logits - m2), axis=-1, keepdims=True))
    logp_ref[...] = (out_logits - lse)[None, :, :]

    @pl.when(t == pl.num_programs(0) - 1)
    def _():
        hout_ref[...] = h1
        cout_ref[...] = c1


# --------------------------------------------------------------------------- #
# Wrappers
# --------------------------------------------------------------------------- #
def prepare_decoder(params):
    """Per-model weight prep (done once): fuse weights for the kernel."""
    return {
        "embedding": params["embedding"].astype(jnp.float32),
        # gates part first (lanes 0..4H-1 = one full vreg), h-projection after.
        "w_h_fused": jnp.concatenate([params["w_hh"], params["wa_h"]], axis=1),  # (H, 5H)
        "w_ih": params["w_ih"],                    # (H+E, 4H): single K=H+E MXU push
        "b_gates": params["b_ih"] + params["b_hh"],
        "wa_e": params["wa_e"],
        "b_a": params["b_a"],
        "v_w": params["v_w"],
        "v_b": params["v_b"],
        "w_out": params["w_out"],
        "b_out": params["b_out"],
    }


def prepare_encoder(prep, encoder_outputs):
    """Decode-step-invariant attention precompute (once per encoder sequence)."""
    S, B, H = encoder_outputs.shape
    e_proj = (encoder_outputs.reshape(S * B, H) @ prep["wa_e"]
              + prep["b_a"]).reshape(S, B, H)
    # batch-major lane-dense layouts: [b, s*H + h]
    eproj_b = jnp.transpose(e_proj, (1, 0, 2)).reshape(B, S * H)
    enc_b = jnp.transpose(encoder_outputs, (1, 0, 2)).reshape(B, S * H)
    pad = (encoder_outputs.sum(axis=-1) == 0.0).astype(jnp.float32)          # (S, B)
    attn_bias = prep["v_b"].reshape(1, 1) - 100000.0 * pad.T                 # (B, S)
    # constant matrices so the kernel needs no in-kernel relayouts:
    vblk = jnp.kron(jnp.eye(S, dtype=jnp.float32),
                    prep["v_w"].reshape(H, 1))                               # (S*H, S)
    expand_R = jnp.kron(jnp.eye(S, dtype=jnp.float32),
                        jnp.ones((1, H), jnp.float32))                       # (S, S*H)
    gsum_G = jnp.kron(jnp.ones((S, 1), jnp.float32),
                      jnp.eye(H, dtype=jnp.float32))                         # (S*H, H)
    return {"eproj_b": eproj_b, "enc_b": enc_b, "attn_bias": attn_bias,
            "vblk": vblk, "expand_R": expand_R, "gsum_G": gsum_G}


def _decode_pallas(prep, enc_pre, hidden, tokens):
    """Run T teacher-forced decode steps in one pallas_call. tokens: (T, B) int."""
    h0_full, c0_full = hidden
    T, B = tokens.shape
    H = h0_full.shape[-1]
    V, E = prep["embedding"].shape

    tokens = tokens.astype(jnp.int32)

    def const_spec(shape):
        zeros = (0,) * len(shape)
        return pl.BlockSpec(shape, lambda t, tok: zeros)   # resident across all steps

    in_arrays = (
        prep["embedding"], h0_full[0], c0_full[0],
        enc_pre["eproj_b"], enc_pre["enc_b"], enc_pre["attn_bias"],
        enc_pre["vblk"], enc_pre["expand_R"], enc_pre["gsum_G"],
        prep["w_h_fused"], prep["w_ih"], prep["b_gates"],
        prep["w_out"], prep["b_out"],
    )
    in_specs = [const_spec(a.shape) for a in in_arrays]

    grid_spec = pltpu.PrefetchScalarGridSpec(
        num_scalar_prefetch=1,
        grid=(T,),
        in_specs=in_specs,
        out_specs=[
            pl.BlockSpec((1, B, V), lambda t, tok: (t, 0, 0)),   # per-step logp
            pl.BlockSpec((B, H), lambda t, tok: (0, 0)),         # final h
            pl.BlockSpec((B, H), lambda t, tok: (0, 0)),         # final c
        ],
        scratch_shapes=[pltpu.VMEM((B, H), jnp.float32),         # carried h
                        pltpu.VMEM((B, H), jnp.float32)],        # carried c
    )

    logp, h1, c1 = pl.pallas_call(
        _decode_kernel,
        out_shape=(jax.ShapeDtypeStruct((T, B, V), jnp.float32),
                   jax.ShapeDtypeStruct((B, H), jnp.float32),
                   jax.ShapeDtypeStruct((B, H), jnp.float32)),
        grid_spec=grid_spec,
        compiler_params=pltpu.CompilerParams(dimension_semantics=("arbitrary",)),
    )(tokens, *in_arrays)

    return logp, (h1[None], c1[None])


def decoder_decode(params, hidden, tokens, encoder_outputs):
    """Multi-step teacher-forced decode: T sequential applications of Decoder.forward."""
    prep = prepare_decoder(params)
    enc_pre = prepare_encoder(prep, encoder_outputs)
    return _decode_pallas(prep, enc_pre, hidden, tokens)


def decoder_forward(params, hidden, last_word, encoder_outputs):
    """Mirrors Decoder.forward(hidden, last_word, encoder_outputs) default path (T=1)."""
    prep = prepare_decoder(params)
    enc_pre = prepare_encoder(prep, encoder_outputs)
    return _decode_pallas(prep, enc_pre, hidden, last_word)


# --------------------------------------------------------------------------- #
# Pure-JAX reference following the PyTorch code line by line
# --------------------------------------------------------------------------- #
def decoder_forward_ref(params, hidden, last_word, encoder_outputs):
    h0, c0 = hidden
    embedded = params["embedding"][last_word]                        # (1, B, E)
    S = encoder_outputs.shape[0]
    h = jnp.broadcast_to(h0, (S,) + h0.shape[1:])                    # hidden[0].repeat(S,1,1)
    cat = jnp.concatenate([h, encoder_outputs], axis=2)              # (S, B, 2H)
    W_a = jnp.concatenate([params["wa_h"], params["wa_e"]], axis=0)  # (2H, H)
    energy = jnp.tanh(cat @ W_a + params["b_a"])
    logits = jnp.sum(energy * params["v_w"], axis=-1) + params["v_b"]
    logits = logits - 100000.0 * (encoder_outputs.sum(axis=2) == 0).astype(jnp.float32)
    w = jax.nn.softmax(logits, axis=0)                               # (S, B)
    attn_weights = jnp.transpose(w)[:, None, :]                      # (B, 1, S)
    context = jnp.einsum("bqs,bsh->bqh", attn_weights,
                         jnp.transpose(encoder_outputs, (1, 0, 2)))  # (B, 1, H)
    context = jnp.transpose(context, (1, 0, 2))                      # (1, B, H)
    rnn_in = jnp.concatenate([context, embedded], axis=2)[0]         # (B, H+E)
    gates = (rnn_in @ params["w_ih"] + params["b_ih"]
             + h0[0] @ params["w_hh"] + params["b_hh"])
    H = h0.shape[2]
    i = jax.nn.sigmoid(gates[:, :H])
    f = jax.nn.sigmoid(gates[:, H:2 * H])
    g = jnp.tanh(gates[:, 2 * H:3 * H])
    o = jax.nn.sigmoid(gates[:, 3 * H:4 * H])
    c1 = f * c0[0] + i * g
    h1 = o * jnp.tanh(c1)
    out_logits = h1 @ params["w_out"] + params["b_out"]
    logp = jax.nn.log_softmax(out_logits, axis=-1)
    return logp[None], (h1[None], c1[None])


if __name__ == "__main__":
    # small shapes: emb_size=32, hid_size=32, vocab_size=64, batch=8, seq=8, T=4 steps
    E, H, V = 32, 32, 64
    B, S, T = 8, 8, 4

    key = jax.random.PRNGKey(0)
    keys = jax.random.split(key, 16)

    def init(k, shape, scale=0.1):
        return (scale * jax.random.normal(k, shape)).astype(jnp.float32)

    params = {
        "embedding": init(keys[0], (V, E)),
        "wa_h": init(keys[1], (H, H)),       # W_a rows multiplying hidden state
        "wa_e": init(keys[2], (H, H)),       # W_a rows multiplying encoder outputs
        "b_a": init(keys[3], (1, H)),
        "v_w": init(keys[4], (1, H)),        # v.weight (1, H)
        "v_b": init(keys[5], (1, 1)),
        "w_ih": init(keys[6], (H + E, 4 * H)),   # LSTM weight_ih^T (input = [context, emb])
        "b_ih": init(keys[7], (1, 4 * H)),
        "w_hh": init(keys[8], (H, 4 * H)),       # LSTM weight_hh^T
        "b_hh": init(keys[9], (1, 4 * H)),
        "w_out": init(keys[10], (H, V)),         # out.weight^T
        "b_out": init(keys[11], (1, V)),
    }

    h0 = init(keys[12], (1, B, H), 0.5)
    c0 = init(keys[13], (1, B, H), 0.5)
    enc = init(keys[14], (S, B, H), 0.5)
    # zero one encoder position to exercise the padding mask (sum(dim=2)==0)
    enc = enc.at[S - 1, 0, :].set(0.0)
    tokens = jax.random.randint(keys[15], (T, B), 0, V, dtype=jnp.int32)

    # ---- multi-step kernel decode (one pallas_call for all T steps) ----------
    logp_all, (h1, c1) = decoder_decode(params, (h0, c0), tokens, enc)
    jax.block_until_ready((logp_all, h1, c1))
    assert logp_all.shape == (T, B, V) and h1.shape == (1, B, H) and c1.shape == (1, B, H)

    # reference: T sequential applications of the module forward
    hid = (h0, c0)
    ref_steps = []
    for t in range(T):
        lp, hid = decoder_forward_ref(params, hid, tokens[t:t + 1], enc)
        ref_steps.append(lp[0])
    logp_ref = jnp.stack(ref_steps, axis=0)
    h_ref, c_ref = hid

    atol = rtol = 5e-3   # pl.reciprocal(approx=True) in the attention softmax
    assert jnp.allclose(logp_all, logp_ref, atol=atol, rtol=rtol)
    assert jnp.allclose(h1, h_ref, atol=atol, rtol=rtol)
    assert jnp.allclose(c1, c_ref, atol=atol, rtol=rtol)

    # ---- single-step path: exact Decoder.forward semantics -------------------
    last_word = tokens[0:1]
    logp1, (h1s, c1s) = decoder_forward(params, (h0, c0), last_word, enc)
    jax.block_until_ready((logp1, h1s, c1s))
    logp1_r, (h1_r, c1_r) = decoder_forward_ref(params, (h0, c0), last_word, enc)
    assert logp1.shape == (1, B, V)
    assert jnp.allclose(logp1, logp1_r, atol=atol, rtol=rtol)
    assert jnp.allclose(h1s, h1_r, atol=atol, rtol=rtol)
    assert jnp.allclose(c1s, c1_r, atol=atol, rtol=rtol)

    print("KERNEL_OK")
</pallas_src>

<mosaic_0001>
module attributes {stable_mosaic.version = 11 : i64} {
  func.func @_decode_kernel(%arg0: i32, %arg1: memref<4x8xi32, #tpu.memory_space<smem>>, %arg2: memref<64x32xf32, #tpu.memory_space<vmem>>, %arg3: memref<8x32xf32, #tpu.memory_space<vmem>>, %arg4: memref<8x32xf32, #tpu.memory_space<vmem>>, %arg5: memref<8x256xf32, #tpu.memory_space<vmem>>, %arg6: memref<8x256xf32, #tpu.memory_space<vmem>>, %arg7: memref<8x8xf32, #tpu.memory_space<vmem>>, %arg8: memref<256x8xf32, #tpu.memory_space<vmem>>, %arg9: memref<8x256xf32, #tpu.memory_space<vmem>>, %arg10: memref<256x32xf32, #tpu.memory_space<vmem>>, %arg11: memref<32x160xf32, #tpu.memory_space<vmem>>, %arg12: memref<64x128xf32, #tpu.memory_space<vmem>>, %arg13: memref<1x128xf32, #tpu.memory_space<vmem>>, %arg14: memref<32x64xf32, #tpu.memory_space<vmem>>, %arg15: memref<1x64xf32, #tpu.memory_space<vmem>>, %arg16: memref<1x8x64xf32, #tpu.memory_space<vmem>>, %arg17: memref<8x32xf32, #tpu.memory_space<vmem>>, %arg18: memref<8x32xf32, #tpu.memory_space<vmem>>, %arg19: memref<8x32xf32, #tpu.memory_space<vmem>>, %arg20: memref<8x32xf32, #tpu.memory_space<vmem>>) attributes {dimension_semantics = [#tpu.dimension_semantics<arbitrary>], iteration_bounds = array<i64: 4>, scalar_prefetch = 1 : i64, scratch_operands = 2 : i64, tpu.core_type = #tpu.core_type<tc>, window_params = [{pipeline_mode = #tpu.pipeline_mode<synchronous>, transform_indices = @transform_0, window_bounds = array<i64: 64, 32>}, {pipeline_mode = #tpu.pipeline_mode<synchronous>, transform_indices = @transform_1, window_bounds = array<i64: 8, 32>}, {pipeline_mode = #tpu.pipeline_mode<synchronous>, transform_indices = @transform_2, window_bounds = array<i64: 8, 32>}, {pipeline_mode = #tpu.pipeline_mode<synchronous>, transform_indices = @transform_3, window_bounds = array<i64: 8, 256>}, {pipeline_mode = #tpu.pipeline_mode<synchronous>, transform_indices = @transform_4, window_bounds = array<i64: 8, 256>}, {pipeline_mode = #tpu.pipeline_mode<synchronous>, transform_indices = @transform_5, window_bounds = array<i64: 8, 8>}, {pipeline_mode = #tpu.pipeline_mode<synchronous>, transform_indices = @transform_6, window_bounds = array<i64: 256, 8>}, {pipeline_mode = #tpu.pipeline_mode<synchronous>, transform_indices = @transform_7, window_bounds = array<i64: 8, 256>}, {pipeline_mode = #tpu.pipeline_mode<synchronous>, transform_indices = @transform_8, window_bounds = array<i64: 256, 32>}, {pipeline_mode = #tpu.pipeline_mode<synchronous>, transform_indices = @transform_9, window_bounds = array<i64: 32, 160>}, {pipeline_mode = #tpu.pipeline_mode<synchronous>, transform_indices = @transform_10, window_bounds = array<i64: 64, 128>}, {pipeline_mode = #tpu.pipeline_mode<synchronous>, transform_indices = @transform_11, window_bounds = array<i64: 1, 128>}, {pipeline_mode = #tpu.pipeline_mode<synchronous>, transform_indices = @transform_12, window_bounds = array<i64: 32, 64>}, {pipeline_mode = #tpu.pipeline_mode<synchronous>, transform_indices = @transform_13, window_bounds = array<i64: 1, 64>}, {transform_indices = @transform_14, window_bounds = array<i64: 1, 8, 64>}, {pipeline_mode = #tpu.pipeline_mode<synchronous>, transform_indices = @transform_15, window_bounds = array<i64: 8, 32>}, {pipeline_mode = #tpu.pipeline_mode<synchronous>, transform_indices = @transform_16, window_bounds = array<i64: 8, 32>}]} {
    %c0_i32 = arith.constant 0 : i32
    %0 = arith.cmpi eq, %arg0, %c0_i32 : i32
    %1 = arith.extui %0 : i1 to i32
    %c0_i32_0 = arith.constant 0 : i32
    %2 = arith.cmpi ne, %1, %c0_i32_0 : i32
    scf.if %2 {
      %c0_51 = arith.constant 0 : index
      %c0_52 = arith.constant 0 : index
      %134 = vector.load %arg3[%c0_51, %c0_52] : memref<8x32xf32, #tpu.memory_space<vmem>>, vector<8x32xf32>
      %c0_53 = arith.constant 0 : index
      %c0_54 = arith.constant 0 : index
      %135 = vector.load %arg19[%c0_53, %c0_54] : memref<8x32xf32, #tpu.memory_space<vmem>>, vector<8x32xf32>
      tpu.vector_store %arg19[%c0_53, %c0_54], %134 {strides = array<i32>} : memref<8x32xf32, #tpu.memory_space<vmem>>, vector<8x32xf32>,
      %c0_55 = arith.constant 0 : index
      %c0_56 = arith.constant 0 : index
      %136 = vector.load %arg4[%c0_55, %c0_56] : memref<8x32xf32, #tpu.memory_space<vmem>>, vector<8x32xf32>
      %c0_57 = arith.constant 0 : index
      %c0_58 = arith.constant 0 : index
      %137 = vector.load %arg20[%c0_57, %c0_58] : memref<8x32xf32, #tpu.memory_space<vmem>>, vector<8x32xf32>
      tpu.vector_store %arg20[%c0_57, %c0_58], %136 {strides = array<i32>} : memref<8x32xf32, #tpu.memory_space<vmem>>, vector<8x32xf32>,
    } else {
    }
    %3 = tpu.iota {dimensions = array<i32: 1>} : vector<8x64xi32>
    %4 = tpu.iota {dimensions = array<i32: 0>} : vector<8x64xi32>
    %c0_i32_1 = arith.constant 0 : i32
    %5 = vector.broadcast %c0_i32_1 : i32 to vector<8x64xi32>
    %c0_i32_2 = arith.constant 0 : i32
    %6 = vector.broadcast %c0_i32_2 : i32 to vector<8x64xi32>
    %7 = arith.cmpi eq, %4, %6 : vector<8x64xi32>
    %8 = arith.index_cast %arg0 : i32 to index
    %c0 = arith.constant 0 : index
    %9 = memref.load %arg1[%8, %c0] : memref<4x8xi32, #tpu.memory_space<smem>>
    %10 = vector.broadcast %9 : i32 to vector<8x64xi32>
    %11 = arith.select %7, %10, %5 : vector<8x64xi1>, vector<8x64xi32>
    %c1_i32 = arith.constant 1 : i32
    %12 = vector.broadcast %c1_i32 : i32 to vector<8x64xi32>
    %13 = arith.cmpi eq, %4, %12 : vector<8x64xi32>
    %14 = arith.index_cast %arg0 : i32 to index
    %c1 = arith.constant 1 : index
    %15 = memref.load %arg1[%14, %c1] : memref<4x8xi32, #tpu.memory_space<smem>>
    %16 = vector.broadcast %15 : i32 to vector<8x64xi32>
    %17 = arith.select %13, %16, %11 : vector<8x64xi1>, vector<8x64xi32>
    %c2_i32 = arith.constant 2 : i32
    %18 = vector.broadcast %c2_i32 : i32 to vector<8x64xi32>
    %19 = arith.cmpi eq, %4, %18 : vector<8x64xi32>
    %20 = arith.index_cast %arg0 : i32 to index
    %c2 = arith.constant 2 : index
    %21 = memref.load %arg1[%20, %c2] : memref<4x8xi32, #tpu.memory_space<smem>>
    %22 = vector.broadcast %21 : i32 to vector<8x64xi32>
    %23 = arith.select %19, %22, %17 : vector<8x64xi1>, vector<8x64xi32>
    %c3_i32 = arith.constant 3 : i32
    %24 = vector.broadcast %c3_i32 : i32 to vector<8x64xi32>
    %25 = arith.cmpi eq, %4, %24 : vector<8x64xi32>
    %26 = arith.index_cast %arg0 : i32 to index
    %c3 = arith.constant 3 : index
    %27 = memref.load %arg1[%26, %c3] : memref<4x8xi32, #tpu.memory_space<smem>>
    %28 = vector.broadcast %27 : i32 to vector<8x64xi32>
    %29 = arith.select %25, %28, %23 : vector<8x64xi1>, vector<8x64xi32>
    %c4_i32 = arith.constant 4 : i32
    %30 = vector.broadcast %c4_i32 : i32 to vector<8x64xi32>
    %31 = arith.cmpi eq, %4, %30 : vector<8x64xi32>
    %32 = arith.index_cast %arg0 : i32 to index
    %c4 = arith.constant 4 : index
    %33 = memref.load %arg1[%32, %c4] : memref<4x8xi32, #tpu.memory_space<smem>>
    %34 = vector.broadcast %33 : i32 to vector<8x64xi32>
    %35 = arith.select %31, %34, %29 : vector<8x64xi1>, vector<8x64xi32>
    %c5_i32 = arith.constant 5 : i32
    %36 = vector.broadcast %c5_i32 : i32 to vector<8x64xi32>
    %37 = arith.cmpi eq, %4, %36 : vector<8x64xi32>
    %38 = arith.index_cast %arg0 : i32 to index
    %c5 = arith.constant 5 : index
    %39 = memref.load %arg1[%38, %c5] : memref<4x8xi32, #tpu.memory_space<smem>>
    %40 = vector.broadcast %39 : i32 to vector<8x64xi32>
    %41 = arith.select %37, %40, %35 : vector<8x64xi1>, vector<8x64xi32>
    %c6_i32 = arith.constant 6 : i32
    %42 = vector.broadcast %c6_i32 : i32 to vector<8x64xi32>
    %43 = arith.cmpi eq, %4, %42 : vector<8x64xi32>
    %44 = arith.index_cast %arg0 : i32 to index
    %c6 = arith.constant 6 : index
    %45 = memref.load %arg1[%44, %c6] : memref<4x8xi32, #tpu.memory_space<smem>>
    %46 = vector.broadcast %45 : i32 to vector<8x64xi32>
    %47 = arith.select %43, %46, %41 : vector<8x64xi1>, vector<8x64xi32>
    %c7_i32 = arith.constant 7 : i32
    %48 = vector.broadcast %c7_i32 : i32 to vector<8x64xi32>
    %49 = arith.cmpi eq, %4, %48 : vector<8x64xi32>
    %50 = arith.index_cast %arg0 : i32 to index
    %c7 = arith.constant 7 : index
    %51 = memref.load %arg1[%50, %c7] : memref<4x8xi32, #tpu.memory_space<smem>>
    %52 = vector.broadcast %51 : i32 to vector<8x64xi32>
    %53 = arith.select %49, %52, %47 : vector<8x64xi1>, vector<8x64xi32>
    %54 = arith.cmpi eq, %3, %53 : vector<8x64xi32>
    %55 = arith.extui %54 : vector<8x64xi1> to vector<8x64xi32>
    %56 = arith.sitofp %55 : vector<8x64xi32> to vector<8x64xf32>
    %c0_3 = arith.constant 0 : index
    %c0_4 = arith.constant 0 : index
    %57 = vector.load %arg2[%c0_3, %c0_4] : memref<64x32xf32, #tpu.memory_space<vmem>>, vector<64x32xf32>
    %cst = arith.constant dense<0.000000e+00> : vector<8x32xf32>
    %58 = tpu.matmul %56, %57, %cst {dimension_numbers = #tpu.dot_dimension_numbers<[1], [0], [0], [1], [0, 0, 1, 1], [], []>} : vector<8x64xf32>, vector<64x32xf32>, vector<8x32xf32> -> vector<8x32xf32>
    %c0_5 = arith.constant 0 : index
    %c0_6 = arith.constant 0 : index
    %59 = vector.load %arg19[%c0_5, %c0_6] : memref<8x32xf32, #tpu.memory_space<vmem>>, vector<8x32xf32>
    %c0_7 = arith.constant 0 : index
    %c0_8 = arith.constant 0 : index
    %60 = vector.load %arg20[%c0_7, %c0_8] : memref<8x32xf32, #tpu.memory_space<vmem>>, vector<8x32xf32>
    %c0_9 = arith.constant 0 : index
    %c0_10 = arith.constant 0 : index
    %61 = vector.load %arg11[%c0_9, %c0_10] : memref<32x160xf32, #tpu.memory_space<vmem>>, vector<32x160xf32>
    %cst_11 = arith.constant dense<0.000000e+00> : vector<8x160xf32>
    %62 = tpu.matmul %59, %61, %cst_11 {dimension_numbers = #tpu.dot_dimension_numbers<[1], [0], [0], [1], [0, 0, 1, 1], [], []>} : vector<8x32xf32>, vector<32x160xf32>, vector<8x160xf32> -> vector<8x160xf32>
    %63 = vector.extract_strided_slice %62 {offsets = [0, 0], sizes = [8, 128], strides = [1, 1]} : vector<8x160xf32> to vector<8x128xf32>
    %64 = vector.extract_strided_slice %62 {offsets = [0, 128], sizes = [8, 32], strides = [1, 1]} : vector<8x160xf32> to vector<8x32xf32>
    %65 = tpu.concatenate %64, %64, %64, %64, %64, %64, %64, %64 in 1 : vector<8x32xf32>, vector<8x32xf32>, vector<8x32xf32>, vector<8x32xf32>, vector<8x32xf32>, vector<8x32xf32>, vector<8x32xf32>, vector<8x32xf32> -> vector<8x256xf32>
    %c0_12 = arith.constant 0 : index
    %c0_13 = arith.constant 0 : index
    %66 = vector.load %arg5[%c0_12, %c0_13] : memref<8x256xf32, #tpu.memory_space<vmem>>, vector<8x256xf32>
    %67 = arith.addf %66, %65 : vector<8x256xf32>
    %68 = math.tanh %67 : vector<8x256xf32>
    %c0_14 = arith.constant 0 : index
    %c0_15 = arith.constant 0 : index
    %69 = vector.load %arg8[%c0_14, %c0_15] : memref<256x8xf32, #tpu.memory_space<vmem>>, vector<256x8xf32>
    %cst_16 = arith.constant dense<0.000000e+00> : vector<8x8xf32>
    %70 = tpu.matmul %68, %69, %cst_16 {dimension_numbers = #tpu.dot_dimension_numbers<[1], [0], [0], [1], [0, 0, 1, 1], [], []>} : vector<8x256xf32>, vector<256x8xf32>, vector<8x8xf32> -> vector<8x8xf32>
    %c0_17 = arith.constant 0 : index
    %c0_18 = arith.constant 0 : index
    %71 = vector.load %arg7[%c0_17, %c0_18] : memref<8x8xf32, #tpu.memory_space<vmem>>, vector<8x8xf32>
    %72 = arith.addf %70, %71 : vector<8x8xf32>
    %cst_19 = arith.constant dense<0xFF800000> : vector<8xf32>
    %73 = vector.multi_reduction <maximumf>, %72, %cst_19 [1] : vector<8x8xf32> to vector<8xf32>
    %74 = vector.shape_cast %73 : vector<8xf32> to vector<8x1xf32>
    %75 = vector.broadcast %74 : vector<8x1xf32> to vector<8x8xf32>
    %76 = arith.subf %72, %75 : vector<8x8xf32>
    %77 = math.exp %76 : vector<8x8xf32>
    %cst_20 = arith.constant dense<0.000000e+00> : vector<8xf32>
    %78 = vector.multi_reduction <add>, %77, %cst_20 [1] : vector<8x8xf32> to vector<8xf32>
    %79 = vector.shape_cast %78 : vector<8xf32> to vector<8x1xf32>
    %80 = tpu.reciprocal %79 {approx = true} : vector<8x1xf32> -> vector<8x1xf32>
    %81 = vector.broadcast %80 : vector<8x1xf32> to vector<8x8xf32>
    %82 = arith.mulf %77, %81 : vector<8x8xf32>
    %c0_21 = arith.constant 0 : index
    %c0_22 = arith.constant 0 : index
    %83 = vector.load %arg9[%c0_21, %c0_22] : memref<8x256xf32, #tpu.memory_space<vmem>>, vector<8x256xf32>
    %cst_23 = arith.constant dense<0.000000e+00> : vector<8x256xf32>
    %84 = tpu.matmul %82, %83, %cst_23 {dimension_numbers = #tpu.dot_dimension_numbers<[1], [0], [0], [1], [0, 0, 1, 1], [], []>} : vector<8x8xf32>, vector<8x256xf32>, vector<8x256xf32> -> vector<8x256xf32>
    %c0_24 = arith.constant 0 : index
    %c0_25 = arith.constant 0 : index
    %85 = vector.load %arg6[%c0_24, %c0_25] : memref<8x256xf32, #tpu.memory_space<vmem>>, vector<8x256xf32>
    %86 = arith.mulf %84, %85 : vector<8x256xf32>
    %c0_26 = arith.constant 0 : index
    %c0_27 = arith.constant 0 : index
    %87 = vector.load %arg10[%c0_26, %c0_27] : memref<256x32xf32, #tpu.memory_space<vmem>>, vector<256x32xf32>
    %cst_28 = arith.constant dense<0.000000e+00> : vector<8x32xf32>
    %88 = tpu.matmul %86, %87, %cst_28 {dimension_numbers = #tpu.dot_dimension_numbers<[1], [0], [0], [1], [0, 0, 1, 1], [], []>} : vector<8x256xf32>, vector<256x32xf32>, vector<8x32xf32> -> vector<8x32xf32>
    %89 = tpu.concatenate %88, %58 in 1 : vector<8x32xf32>, vector<8x32xf32> -> vector<8x64xf32>
    %c0_29 = arith.constant 0 : index
    %c0_30 = arith.constant 0 : index
    %90 = vector.load %arg12[%c0_29, %c0_30] : memref<64x128xf32, #tpu.memory_space<vmem>>, vector<64x128xf32>
    %cst_31 = arith.constant dense<0.000000e+00> : vector<8x128xf32>
    %91 = tpu.matmul %89, %90, %cst_31 {dimension_numbers = #tpu.dot_dimension_numbers<[1], [0], [0], [1], [0, 0, 1, 1], [], []>} : vector<8x64xf32>, vector<64x128xf32>, vector<8x128xf32> -> vector<8x128xf32>
    %92 = arith.addf %91, %63 : vector<8x128xf32>
    %c0_32 = arith.constant 0 : index
    %c0_33 = arith.constant 0 : index
    %93 = vector.load %arg13[%c0_32, %c0_33] : memref<1x128xf32, #tpu.memory_space<vmem>>, vector<1x128xf32>
    %94 = vector.broadcast %93 : vector<1x128xf32> to vector<8x128xf32>
    %95 = arith.addf %92, %94 : vector<8x128xf32>
    %96 = arith.negf %95 : vector<8x128xf32>
    %97 = math.exp %96 : vector<8x128xf32>
    %cst_34 = arith.constant 1.000000e+00 : f32
    %98 = vector.broadcast %cst_34 : f32 to vector<8x128xf32>
    %99 = arith.addf %98, %97 : vector<8x128xf32>
    %100 = arith.divf %98, %99 : vector<8x128xf32>
    %101 = math.tanh %95 : vector<8x128xf32>
    %102 = vector.extract_strided_slice %100 {offsets = [0, 0], sizes = [8, 32], strides = [1, 1]} : vector<8x128xf32> to vector<8x32xf32>
    %103 = vector.extract_strided_slice %100 {offsets = [0, 32], sizes = [8, 32], strides = [1, 1]} : vector<8x128xf32> to vector<8x32xf32>
    %104 = vector.extract_strided_slice %101 {offsets = [0, 64], sizes = [8, 32], strides = [1, 1]} : vector<8x128xf32> to vector<8x32xf32>
    %105 = vector.extract_strided_slice %100 {offsets = [0, 96], sizes = [8, 32], strides = [1, 1]} : vector<8x128xf32> to vector<8x32xf32>
    %106 = arith.mulf %103, %60 : vector<8x32xf32>
    %107 = arith.mulf %102, %104 : vector<8x32xf32>
    %108 = arith.addf %106, %107 : vector<8x32xf32>
    %109 = math.tanh %108 : vector<8x32xf32>
    %110 = arith.mulf %105, %109 : vector<8x32xf32>
    %c0_35 = arith.constant 0 : index
    %c0_36 = arith.constant 0 : index
    %111 = vector.load %arg19[%c0_35, %c0_36] : memref<8x32xf32, #tpu.memory_space<vmem>>, vector<8x32xf32>
    tpu.vector_store %arg19[%c0_35, %c0_36], %110 {strides = array<i32>} : memref<8x32xf32, #tpu.memory_space<vmem>>, vector<8x32xf32>,
    %c0_37 = arith.constant 0 : index
    %c0_38 = arith.constant 0 : index
    %112 = vector.load %arg20[%c0_37, %c0_38] : memref<8x32xf32, #tpu.memory_space<vmem>>, vector<8x32xf32>
    tpu.vector_store %arg20[%c0_37, %c0_38], %108 {strides = array<i32>} : memref<8x32xf32, #tpu.memory_space<vmem>>, vector<8x32xf32>,
    %c0_39 = arith.constant 0 : index
    %c0_40 = arith.constant 0 : index
    %113 = vector.load %arg14[%c0_39, %c0_40] : memref<32x64xf32, #tpu.memory_space<vmem>>, vector<32x64xf32>
    %cst_41 = arith.constant dense<0.000000e+00> : vector<8x64xf32>
    %114 = tpu.matmul %110, %113, %cst_41 {dimension_numbers = #tpu.dot_dimension_numbers<[1], [0], [0], [1], [0, 0, 1, 1], [], []>} : vector<8x32xf32>, vector<32x64xf32>, vector<8x64xf32> -> vector<8x64xf32>
    %c0_42 = arith.constant 0 : index
    %c0_43 = arith.constant 0 : index
    %115 = vector.load %arg15[%c0_42, %c0_43] : memref<1x64xf32, #tpu.memory_space<vmem>>, vector<1x64xf32>
    %116 = vector.broadcast %115 : vector<1x64xf32> to vector<8x64xf32>
    %117 = arith.addf %114, %116 : vector<8x64xf32>
    %cst_44 = arith.constant dense<0xFF800000> : vector<8xf32>
    %118 = vector.multi_reduction <maximumf>, %117, %cst_44 [1] : vector<8x64xf32> to vector<8xf32>
    %119 = vector.shape_cast %118 : vector<8xf32> to vector<8x1xf32>
    %120 = vector.broadcast %119 : vector<8x1xf32> to vector<8x64xf32>
    %121 = arith.subf %117, %120 : vector<8x64xf32>
    %122 = math.exp %121 : vector<8x64xf32>
    %cst_45 = arith.constant dense<0.000000e+00> : vector<8xf32>
    %123 = vector.multi_reduction <add>, %122, %cst_45 [1] : vector<8x64xf32> to vector<8xf32>
    %124 = vector.shape_cast %123 : vector<8xf32> to vector<8x1xf32>
    %125 = math.log %124 : vector<8x1xf32>
    %126 = arith.addf %119, %125 : vector<8x1xf32>
    %127 = vector.broadcast %126 : vector<8x1xf32> to vector<8x64xf32>
    %128 = arith.subf %117, %127 : vector<8x64xf32>
    %129 = vector.shape_cast %128 : vector<8x64xf32> to vector<1x8x64xf32>
    %c0_46 = arith.constant 0 : index
    %c0_47 = arith.constant 0 : index
    %c0_48 = arith.constant 0 : index
    %130 = vector.load %arg16[%c0_46, %c0_47, %c0_48] : memref<1x8x64xf32, #tpu.memory_space<vmem>>, vector<1x8x64xf32>
    tpu.vector_store %arg16[%c0_46, %c0_47, %c0_48], %129 {strides = array<i32>} : memref<1x8x64xf32, #tpu.memory_space<vmem>>, vector<1x8x64xf32>,
    %c3_i32_49 = arith.constant 3 : i32
    %131 = arith.cmpi eq, %arg0, %c3_i32_49 : i32
    %132 = arith.extui %131 : i1 to i32
    %c0_i32_50 = arith.constant 0 : i32
    %133 = arith.cmpi ne, %132, %c0_i32_50 : i32
    scf.if %133 {
      %c0_51 = arith.constant 0 : index
      %c0_52 = arith.constant 0 : index
      %134 = vector.load %arg17[%c0_51, %c0_52] : memref<8x32xf32, #tpu.memory_space<vmem>>, vector<8x32xf32>
      tpu.vector_store %arg17[%c0_51, %c0_52], %110 {strides = array<i32>} : memref<8x32xf32, #tpu.memory_space<vmem>>, vector<8x32xf32>,
      %c0_53 = arith.constant 0 : index
      %c0_54 = arith.constant 0 : index
      %135 = vector.load %arg18[%c0_53, %c0_54] : memref<8x32xf32, #tpu.memory_space<vmem>>, vector<8x32xf32>
      tpu.vector_store %arg18[%c0_53, %c0_54], %108 {strides = array<i32>} : memref<8x32xf32, #tpu.memory_space<vmem>>, vector<8x32xf32>,
    } else {
    }
    return
  }
  func.func @transform_0(%arg0: i32, %arg1: memref<4x8xi32, #tpu.memory_space<smem>>) -> (i32, i32) {
    %c0_i32 = arith.constant 0 : i32
    %c0_i32_0 = arith.constant 0 : i32
    %c0_i32_1 = arith.constant 0 : i32
    return %c0_i32, %c0_i32_0 : i32, i32
  }
  func.func @transform_1(%arg0: i32, %arg1: memref<4x8xi32, #tpu.memory_space<smem>>) -> (i32, i32) {
    %c0_i32 = arith.constant 0 : i32
    %c0_i32_0 = arith.constant 0 : i32
    %c0_i32_1 = arith.constant 0 : i32
    return %c0_i32, %c0_i32_0 : i32, i32
  }
  func.func @transform_2(%arg0: i32, %arg1: memref<4x8xi32, #tpu.memory_space<smem>>) -> (i32, i32) {
    %c0_i32 = arith.constant 0 : i32
    %c0_i32_0 = arith.constant 0 : i32
    %c0_i32_1 = arith.constant 0 : i32
    return %c0_i32, %c0_i32_0 : i32, i32
  }
  func.func @transform_3(%arg0: i32, %arg1: memref<4x8xi32, #tpu.memory_space<smem>>) -> (i32, i32) {
    %c0_i32 = arith.constant 0 : i32
    %c0_i32_0 = arith.constant 0 : i32
    %c0_i32_1 = arith.constant 0 : i32
    return %c0_i32, %c0_i32_0 : i32, i32
  }
  func.func @transform_4(%arg0: i32, %arg1: memref<4x8xi32, #tpu.memory_space<smem>>) -> (i32, i32) {
    %c0_i32 = arith.constant 0 : i32
    %c0_i32_0 = arith.constant 0 : i32
    %c0_i32_1 = arith.constant 0 : i32
    return %c0_i32, %c0_i32_0 : i32, i32
  }
  func.func @transform_5(%arg0: i32, %arg1: memref<4x8xi32, #tpu.memory_space<smem>>) -> (i32, i32) {
    %c0_i32 = arith.constant 0 : i32
    %c0_i32_0 = arith.constant 0 : i32
    %c0_i32_1 = arith.constant 0 : i32
    return %c0_i32, %c0_i32_0 : i32, i32
  }
  func.func @transform_6(%arg0: i32, %arg1: memref<4x8xi32, #tpu.memory_space<smem>>) -> (i32, i32) {
    %c0_i32 = arith.constant 0 : i32
    %c0_i32_0 = arith.constant 0 : i32
    %c0_i32_1 = arith.constant 0 : i32
    return %c0_i32, %c0_i32_0 : i32, i32
  }
  func.func @transform_7(%arg0: i32, %arg1: memref<4x8xi32, #tpu.memory_space<smem>>) -> (i32, i32) {
    %c0_i32 = arith.constant 0 : i32
    %c0_i32_0 = arith.constant 0 : i32
    %c0_i32_1 = arith.constant 0 : i32
    return %c0_i32, %c0_i32_0 : i32, i32
  }
  func.func @transform_8(%arg0: i32, %arg1: memref<4x8xi32, #tpu.memory_space<smem>>) -> (i32, i32) {
    %c0_i32 = arith.constant 0 : i32
    %c0_i32_0 = arith.constant 0 : i32
    %c0_i32_1 = arith.constant 0 : i32
    return %c0_i32, %c0_i32_0 : i32, i32
  }
  func.func @transform_9(%arg0: i32, %arg1: memref<4x8xi32, #tpu.memory_space<smem>>) -> (i32, i32) {
    %c0_i32 = arith.constant 0 : i32
    %c0_i32_0 = arith.constant 0 : i32
    %c0_i32_1 = arith.constant 0 : i32
    return %c0_i32, %c0_i32_0 : i32, i32
  }
  func.func @transform_10(%arg0: i32, %arg1: memref<4x8xi32, #tpu.memory_space<smem>>) -> (i32, i32) {
    %c0_i32 = arith.constant 0 : i32
    %c0_i32_0 = arith.constant 0 : i32
    %c0_i32_1 = arith.constant 0 : i32
    return %c0_i32, %c0_i32_0 : i32, i32
  }
  func.func @transform_11(%arg0: i32, %arg1: memref<4x8xi32, #tpu.memory_space<smem>>) -> (i32, i32) {
    %c0_i32 = arith.constant 0 : i32
    %c0_i32_0 = arith.constant 0 : i32
    %c0_i32_1 = arith.constant 0 : i32
    return %c0_i32, %c0_i32_0 : i32, i32
  }
  func.func @transform_12(%arg0: i32, %arg1: memref<4x8xi32, #tpu.memory_space<smem>>) -> (i32, i32) {
    %c0_i32 = arith.constant 0 : i32
    %c0_i32_0 = arith.constant 0 : i32
    %c0_i32_1 = arith.constant 0 : i32
    return %c0_i32, %c0_i32_0 : i32, i32
  }
  func.func @transform_13(%arg0: i32, %arg1: memref<4x8xi32, #tpu.memory_space<smem>>) -> (i32, i32) {
    %c0_i32 = arith.constant 0 : i32
    %c0_i32_0 = arith.constant 0 : i32
    %c0_i32_1 = arith.constant 0 : i32
    return %c0_i32, %c0_i32_0 : i32, i32
  }
  func.func @transform_14(%arg0: i32, %arg1: memref<4x8xi32, #tpu.memory_space<smem>>) -> (i32, i32, i32) {
    %c0_i32 = arith.constant 0 : i32
    %c0_i32_0 = arith.constant 0 : i32
    %c0_i32_1 = arith.constant 0 : i32
    return %arg0, %c0_i32, %c0_i32_0 : i32, i32, i32
  }
  func.func @transform_15(%arg0: i32, %arg1: memref<4x8xi32, #tpu.memory_space<smem>>) -> (i32, i32) {
    %c0_i32 = arith.constant 0 : i32
    %c0_i32_0 = arith.constant 0 : i32
    %c0_i32_1 = arith.constant 0 : i32
    return %c0_i32, %c0_i32_0 : i32, i32
  }
  func.func @transform_16(%arg0: i32, %arg1: memref<4x8xi32, #tpu.memory_space<smem>>) -> (i32, i32) {
    %c0_i32 = arith.constant 0 : i32
    %c0_i32_0 = arith.constant 0 : i32
    %c0_i32_1 = arith.constant 0 : i32
    return %c0_i32, %c0_i32_0 : i32, i32
  }
}

</mosaic_0001>

<bundles_post_ra>
// kernel: tpu_custom_call.1
= control target key start
LH: loop header
LB: loop body
LE: loop exit
PB: predicated region body
PF: predicated region fallthrough
CT: control target
= control target key end

     0   :  { %s1367_s27 = smov [#allocation5]   ;;  %s1922_s0 = inlined_call_operand.vmem [shape: s32[4,8], index: 0, kind: input, shape index: {}]   ;;  %s1923_s1 = inlined_call_operand.vmem [shape: f32[64,32], index: 1, kind: input, shape index: {}]   ;;  %s1924_s2 = inlined_call_operand.vmem [shape: f32[8,32], index: 2, kind: input, shape index: {}]   ;;  %s1925_s3 = inlined_call_operand.vmem [shape: f32[8,32], index: 3, kind: input, shape index: {}]   ;;  %s1926_s4 = inlined_call_operand.vmem [shape: f32[8,256], index: 4, kind: input, shape index: {}]   ;;  %s1927_s5 = inlined_call_operand.vmem [shape: f32[8,256], index: 5, kind: input, shape index: {}]   ;;  %s1928_s6 = inlined_call_operand.vmem [shape: f32[8,8], index: 6, kind: input, shape index: {}]   ;;  %s1929_s7 = inlined_call_operand.vmem [shape: f32[256,8], index: 7, kind: input, shape index: {}]   ;;  %s1930_s8 = inlined_call_operand.vmem [shape: f32[8,256], index: 8, kind: input, shape index: {}]   ;;  %s1931_s9 = inlined_call_operand.vmem [shape: f32[256,32], index: 9, kind: input, shape index: {}]   ;;  %s1932_s10 = inlined_call_operand.vmem [shape: f32[32,160], index: 10, kind: input, shape index: {}]   ;;  %s1933_s11 = inlined_call_operand.vmem [shape: f32[64,128], index: 11, kind: input, shape index: {}]   ;;  %s1934_s12 = inlined_call_operand.vmem [shape: f32[1,128], index: 12, kind: input, shape index: {}]   ;;  %s1935_s13 = inlined_call_operand.vmem [shape: f32[32,64], index: 13, kind: input, shape index: {}]   ;;  %s1936_s14 = inlined_call_operand.vmem [shape: f32[1,64], index: 14, kind: input, shape index: {}]   ;;  %s1937_s15 = inlined_call_operand.hbm [shape: f32[4,8,64], index: 15, kind: output, shape index: {0}]   ;;  %s1938_s16 = inlined_call_operand.hbm [shape: f32[8,32], index: 16, kind: output, shape index: {1}]   ;;  %s1939_s17 = inlined_call_operand.hbm [shape: f32[8,32], index: 17, kind: output, shape index: {2}]  }
   0x1   :  { %1953 = sst [smem:[#allocation19_spill]] %s1922_s0 }
   0x2   :  { %1954 = sst [smem:[#allocation20_spill]] %s1923_s1 }
   0x3   :  { %1955 = sst [smem:[#allocation21_spill]] %s1924_s2 }
   0x4   :  { %1956 = sst [smem:[#allocation22_spill]] %s1925_s3 }
   0x5   :  { %1957 = sst [smem:[#allocation23_spill]] %s1926_s4 }
   0x6   :  { %1958 = sst [smem:[#allocation24_spill]] %s1928_s6 }
   0x7   :  { %1959 = sst [smem:[#allocation25_spill]] %s1929_s7 }
   0x8   :  { %1960 = sst [smem:[#allocation26_spill]] %s1932_s10 }
   0x9   :  { %1961 = sst [smem:[#allocation27_spill]] %s1933_s11 }
   0xa   :  { %s1962_s26 = sld [smem:[#allocation19_spill]] }
  0x10   :  { %s24_s11 = sshll.u32 %s1962_s26, 4  ;;  %s25_s11 = int_to_ptr.vmem [resolvable:$true] %s24_s11 }
  0x11   :  { %27 = dma.vmem_to_smem %s25_s11, 64, %s1367_s27, [#allocation4] }
  0x12   :  { %1341 = dma.done.wait [#allocation4], 64 }
  0x13   :  { %1342 = vsyncadd [#allocation4], 4294967232 }
  0x14   :  { %30 = sfence }
  0x15   :  { %31 = vsyncpa [#allocation7], 0 }
  0x16   :  { %33 = vsyncpa [#allocation7 + $0x1], 0 }
  0x17   :  { %34 = vsyncpa [#allocation9], 0  ;;  %s1467_s28 = smov 0   ;;  %s1469_s29 = smov 0  }
  0x18   :  { %s1471_s0 = smov 0   ;;  %s1473_s30 = smov 0  }
  0x19 LB: > { %1963 = sst [smem:[#allocation14_spill]] %s1353_s28  ;;  %s1488_s11 = sadd.s32 4294967295, %s1365_s30   ;;  %s1365_s30 = sphi %s1473_s30, %s1986_s30   ;;  %s1361_s0 = sphi %s1471_s0, %s1988_s0   ;;  %s1357_s29 = sphi %s1469_s29, %s1990_s29   ;;  %s1353_s28 = sphi %s1467_s28, %s1989_s28  }
  0x1a   : > { %1964 = sst [smem:[#allocation15_spill]] %s1361_s0  ;;  %s1125_s18 = sadd.s32 4294967294, %s1365_s30  }
  0x1b   : > { %s1492_s19 = sadd.s32 1, %s1365_s30   ;;  %s341_s1 = sadd.s32 1, %s1361_s0 }
  0x1c   : > { %1965 = sst [smem:[#allocation16_spill]] %s1492_s19  ;;  %s338_s20 = ssub.s32 %s1365_s30, %s1492_s19 }
  0x1d   : > { %p351_p0 = scmp.ne.s32.totalorder %s1361_s0, %s1357_s29  ;;  %p339_p1 = scmp.eq.s32.totalorder %s338_s20, 0 }
  0x1e   : > { %p352_p2 = scmp.eq.s32.totalorder %s1488_s11, 3  ;;  %p357_p3 = scmp.ne.s32.totalorder %s1357_s29, %s1353_s28 }
  0x1f   : > { %p358_p4 = scmp.eq.s32.totalorder %s1125_s18, 3  ;;  %p1127_p7 = scmp.ge.s32.totalorder %s1365_s30, 1 }
  0x20   : > { %s1503_s21 = scalar_select %p339_p1, %s1361_s0, %s341_s1  }
  0x21   : > { %p1507_p5 = por %p352_p2, %p351_p0  ;;  %p1511_p6 = por %p358_p4, %p357_p3 }
  0x22   : > { %1966 = sst [smem:[#allocation17_spill]] %s1503_s21  ;;  %p460_p8 = scmp.lt.s32.totalorder %s1365_s30, 5 }
  0x23   : > { %s1968_s23 = scalar_select %p1511_p6, 1, 0 }
  0x24   : > { %p461_p9 = pnand %p1127_p7, %p460_p8 }
  0x25   : > { %1969 = sst [smem:[#allocation18_spill]] %s1968_s23  ;;  %s1942_s24 = sand.u32 (!%p461_p9), 1, %s1357_s29  }
  0x26   : > { %464 = sbr.rel (%p461_p9) target bundleno = 1995 (0x7cb), region = 76  ;;  %s1520_s25 = sshll.u32 (!%p461_p9), %s1942_s24, 3 }
  0x27   : > { %p1129_p10 = scmp.ne.s32.totalorder (!%p461_p9), %s1488_s11, 0 }
  0x2b   : > { %508 = sbr.rel (%p1129_p10) target bundleno = 52 (0x34), region = 80  ;;  %s1970_s2 = sld [smem:[#allocation21_spill]] (!%p1129_p10) }
  0x2c   : > { %s1971_s3 = sld [smem:[#allocation22_spill]] (!%p1129_p10) }
  0x30   : > { %vm510_vm0 = vcmask 261120  }
  0x31   : > { %v509_v0 = vld [vmem:[%s1970_s2] sm:$0xff] }
  0x32   : > { %v512_v1 = vld [vmem:[%s1971_s3] sm:$0xff]  ;;  %511 = vst.msk [vmem:[#allocation2] sm:$0xff] %vm510_vm0, %v509_v0 }
  0x33   : > { %513 = vst.msk [vmem:[#allocation3] sm:$0xff] %vm510_vm0, %v512_v1 }
  0x34 PF: > { %s1972_s10 = sld [smem:[#allocation26_spill]]  ;;  %vm603_vm1 = vcmask 261120   ;;  %s1946_s0 = smov 96   ;;  %vm569_vm2 = vcmask 523264   ;;  %vm659_vm3 = vcmask 785408   ;;  %vm740_vm4 = vcmask 64512  }
  0x35   : > { %s1973_s7 = sld [smem:[#allocation25_spill]]  ;;  %s1947_s26 = smov 32  }
  0x36   : > { %s1949_s19 = smov 64   ;;  %s1974_s4 = sld [smem:[#allocation23_spill]] }
  0x37   : > { %s1975_s6 = sld [smem:[#allocation24_spill]]  ;;  %s1130_s3 = sshll.u32 %s1488_s11, 7 }
  0x38   : > { %s524_s27 = sadd.s32 1, %s1130_s3  ;;  %s529_s18 = sadd.s32 2, %s1130_s3 }
  0x39   : > { %v593_v6 = vld [vmem:[#allocation2] sm:$0xff]  ;;  %s520_s2 = sld [smem:[#allocation5 + %s1130_s3]]  ;;  %s534_s1 = sadd.s32 3, %s1130_s3 }
  0x3a   : > { %v602_v2 = vld [vmem:[%s1972_s10 + $0x38] sm:$0xff]  ;;  %v600_v3 = vld [vmem:[%s1972_s10 + $0x28] sm:$0xff]  ;;  %v601_v7 = vld [vmem:[%s1972_s10 + $0x30] sm:$0xff]  ;;  %s525_s21 = sld [smem:[#allocation5 + %s524_s27]]  ;;  %s544_s24 = sadd.s32 5, %s1130_s3 }
  0x3b   : > { %639 = vmatpush.msra.mxu2 %v602_v2  ;;  %v598_v4 = vld [vmem:[%s1972_s10 + $0x18] sm:$0xff]  ;;  %v596_v5 = vld [vmem:[%s1972_s10 + $0x8] sm:$0xff]  ;;  %v599_v8 = vld [vmem:[%s1972_s10 + $0x20] sm:$0xff]  ;;  %619 = vmatpush.msra.mxu1 %v601_v7  ;;  %s535_s20 = sld [smem:[#allocation5 + %s534_s1]]  ;;  %p1140_p11 = scmp.ne.s32.totalorder %s1488_s11, 3 }
  0x3c   : > { %v682_v9 = vld [vmem:[%s1973_s7 + $0x78] sm:$0xff]  ;;  %v597_v10 = vld [vmem:[%s1972_s10 + $0x10] sm:$0xff]  ;;  %v680_v12 = vld [vmem:[%s1973_s7 + $0x68] sm:$0xff] }
  0x3d   : > { %640 = vmatpush.msra.mxu2 %v600_v3  ;;  %700 = vmatpush.msra.mxu3 %v682_v9  ;;  %v681_v11 = vld [vmem:[%s1973_s7 + $0x70] sm:$0xff]  ;;  %v595_v13 = vld [vmem:[%s1972_s10] sm:$0xff]  ;;  %v698_v14 = vld [vmem:[%s1973_s7 + $0xf8] sm:$0xff]  ;;  %s545_s10 = sld [smem:[#allocation5 + %s544_s24]] }
  0x3e   : > { %620 = vmatpush.msra.mxu1 %v599_v8  ;;  %v679_v15 = vld [vmem:[%s1973_s7 + $0x60] sm:$0xff]  ;;  %v697_v16 = vld [vmem:[%s1973_s7 + $0xf0] sm:$0xff]  ;;  %v678_v17 = vld [vmem:[%s1973_s7 + $0x58] sm:$0xff]  ;;  %s1978_s24 = sld [smem:[#allocation27_spill]] }
  0x3f   : > { %641 = vmatpush.msra.mxu2 %v598_v4  ;;  %701 = vmatpush.msra.mxu3 %v681_v11  ;;  %v696_v18 = vld [vmem:[%s1973_s7 + $0xe8] sm:$0xff]  ;;  %v677_v19 = vld [vmem:[%s1973_s7 + $0x50] sm:$0xff]  ;;  %v695_v20 = vld [vmem:[%s1973_s7 + $0xe0] sm:$0xff]  ;;  %v514_v11 = vlaneseq }
  0x40   : > { %621 = vmatpush.msra.mxu1 %v597_v10  ;;  %v694_v21 = vld [vmem:[%s1973_s7 + $0xd8] sm:$0xff]  ;;  %v693_v22 = vld [vmem:[%s1973_s7 + $0xd0] sm:$0xff]  ;;  %v676_v24 = vld [vmem:[%s1973_s7 + $0x48] sm:$0xff] }
  0x41   : > { %642 = vmatpush.msra.mxu2 %v596_v5  ;;  %702 = vmatpush.msra.mxu3 %v680_v12  ;;  %v692_v25 = vld [vmem:[%s1973_s7 + $0xc8] sm:$0xff]  ;;  %v675_v26 = vld [vmem:[%s1973_s7 + $0x40] sm:$0xff]  ;;  %v674_v28 = vld [vmem:[%s1973_s7 + $0x38] sm:$0xff]  ;;  %v517_v12 = vshrl.u32 %v514_v11, 7 }
  0x42   : > { %1134 = vmatmul.msk.f32.vlgmr.msra.gmra.mxu2 %vm603_vm1, %v593_v6  ;;  %622 = vmatpush.msra.mxu1 %v595_v13  ;;  %v691_v27 = vld [vmem:[%s1973_s7 + $0xc0] sm:$0xff]  ;;  %v690_v29 = vld [vmem:[%s1973_s7 + $0xb8] sm:$0xff]  ;;  %v673_v30 = vld [vmem:[%s1973_s7 + $0x30] sm:$0xff]  ;;  %v521_v13 = vstv %s520_s2 }
  0x43   : > { %703 = vmatpush.msra.mxu3 %v679_v15  ;;  %1133 = vmatmul.msk.f32.vlgmr.msra.gmra.mxu1 %vm603_vm1, %v593_v6  ;;  %v689_v31 = vld [vmem:[%s1973_s7 + $0xb0] sm:$0xff]  ;;  %v672_v32 = vld [vmem:[%s1973_s7 + $0x28] sm:$0xff]  ;;  %v671_v34 = vld [vmem:[%s1973_s7 + $0x20] sm:$0xff]  ;;  %vm518_vm5 = vcmp.eq.s32.totalorder %v517_v12, 0  ;;  %vm523_vm6 = vcmp.eq.s32.totalorder %v517_v12, 1  ;;  %v526_v15 = vstv %s525_s21  ;;  %vm528_vm7 = vcmp.eq.s32.totalorder %v517_v12, 2 }
  0x44   : > { %720 = vmatpush.msrb.mxu1 %v698_v14  ;;  %v688_v33 = vld [vmem:[%s1973_s7 + $0xa8] sm:$0xff]  ;;  %v687_v35 = vld [vmem:[%s1973_s7 + $0xa0] sm:$0xff]  ;;  %v670_v36 = vld [vmem:[%s1973_s7 + $0x18] sm:$0xff]  ;;  %v522_v14 = vsel %vm518_vm5, %v521_v13, 0  ;;  %vm533_vm8 = vcmp.eq.s32.totalorder %v517_v12, 3  ;;  %vm538_vm9 = vcmp.eq.s32.totalorder %v517_v12, 4 }
  0x45   : > { %704 = vmatpush.msra.mxu3 %v678_v17  ;;  %v686_v37 = vld [vmem:[%s1973_s7 + $0x98] sm:$0xff]  ;;  %v669_v38 = vld [vmem:[%s1973_s7 + $0x10] sm:$0xff]  ;;  %v668_v40 = vld [vmem:[%s1973_s7 + $0x8] sm:$0xff]  ;;  %vm543_vm10 = vcmp.eq.s32.totalorder %v517_v12, 5  ;;  %vm548_vm11 = vcmp.eq.s32.totalorder %v517_v12, 6  ;;  %vm553_vm12 = vcmp.eq.s32.totalorder %v517_v12, 7 }
  0x46   : > { %721 = vmatpush.msrb.mxu1 %v697_v16  ;;  %v685_v39 = vld [vmem:[%s1973_s7 + $0x90] sm:$0xff]  ;;  %v684_v41 = vld [vmem:[%s1973_s7 + $0x88] sm:$0xff]  ;;  %v667_v42 = vld [vmem:[%s1973_s7] sm:$0xff]  ;;  %v527_v16 = vsel %vm523_vm6, %v526_v15, %v522_v14 }
  0x47   : > { %705 = vmatpush.msra.mxu3 %v677_v19  ;;  %v683_v43 = vld [vmem:[%s1973_s7 + $0x80] sm:$0xff]  ;;  %v662_v47 = vld [vmem:[%s1974_s4 + $0x8] sm:$0xff]  ;;  %s554_s7 = sadd.s32 7, %s1130_s3  ;;  %v536_v19 = vstv %s535_s20  ;;  %v885_v14 = vld [vmem:[%s1978_s24 + $0x38] sm:$0xff] }
  0x48   : > { %722 = vmatpush.msrb.mxu1 %v696_v18  ;;  %v661_v46 = vld [vmem:[%s1974_s4] sm:$0xff]  ;;  %s549_s4 = sadd.s32 6, %s1130_s3  ;;  %s555_s28 = sld [smem:[#allocation5 + %s554_s7]]  ;;  %v884_v15 = vld [vmem:[%s1978_s24 + $0x30] sm:$0xff] }
  0x49   : > { %706 = vmatpush.msra.mxu3 %v676_v24  ;;  %v699_v57 = vld [vmem:[%s1975_s6] sm:$0xff]  ;;  %s550_s23 = sld [smem:[#allocation5 + %s549_s4]]  ;;  %s1979_s7 = smov 64  }
  0x4a   : > { %723 = vmatpush.msrb.mxu1 %v695_v20 }
  0x4b   : > { %707 = vmatpush.msra.mxu3 %v675_v26  ;;  %v515_v26 = vand.u32 127, %v514_v11  ;;  %v797_v11 = vld [vmem:[%s1927_s5] sm:$0xff] }
  0x4c   : > { %724 = vmatpush.msrb.mxu1 %v694_v21 }
  0x4d   : > { %708 = vmatpush.msra.mxu3 %v674_v28 }
  0x4e   : > { %725 = vmatpush.msrb.mxu1 %v693_v22  ;;  %v556_v28 = vstv %s555_s28 }
  0x4f   : > { %709 = vmatpush.msra.mxu3 %v673_v30 }
  0x50   : > { %726 = vmatpush.msrb.mxu1 %v692_v25  ;;  %v551_v25 = vstv %s550_s23  ;;  %s1977_s23 = smov 32  }
  0x51   : > { %710 = vmatpush.msra.mxu3 %v672_v32  ;;  %v753_v32 = vld [vmem:[%s1930_s8 + $0x8] sm:$0xff] }
  0x52   : > { %727 = vmatpush.msrb.mxu1 %v691_v27 }
  0x53   : > { %711 = vmatpush.msra.mxu3 %v671_v34 }
  0x54   : > { %728 = vmatpush.msrb.mxu1 %v690_v29 }
  0x55   : > { %712 = vmatpush.msra.mxu3 %v670_v36  ;;  %v831_v36 = vld [vmem:[%s1931_s9 + $0xf0] sm:$0xff] }
  0x56   : > { %729 = vmatpush.msrb.mxu1 %v689_v31  ;;  %v752_v31 = vld [vmem:[%s1930_s8] sm:$0xff] }
  0x57   : > { %713 = vmatpush.msra.mxu3 %v669_v38  ;;  %772 = vmatpush.msrb.mxu2 %v752_v31  ;;  %v815_v38 = vld [vmem:[%s1931_s9 + $0x70] sm:$0xff] }
  0x58   : > { %730 = vmatpush.msrb.mxu1 %v688_v33  ;;  %v1371_v33 = vmov 0.0  }
  0x59   : > { %714 = vmatpush.msra.mxu3 %v668_v40  ;;  %v814_v40 = vld [vmem:[%s1931_s9 + $0x68] sm:$0xff] }
  0x5a   : > { %731 = vmatpush.msrb.mxu1 %v687_v35  ;;  %v832_v35 = vld [vmem:[%s1931_s9 + $0xf8] sm:$0xff] }
  0x5b   : > { %715 = vmatpush.msra.mxu3 %v667_v42  ;;  %v813_v42 = vld [vmem:[%s1931_s9 + $0x60] sm:$0xff] }
  0x5c   : > { %732 = vmatpush.msrb.mxu1 %v686_v37  ;;  %v816_v37 = vld [vmem:[%s1931_s9 + $0x78] sm:$0xff] }
  0x5d   : > { %833 = vmatpush.msra.mxu2 %v816_v37  ;;  %897 = vmatpush.msrb.mxu3 %v885_v14 }
  0x5e   : > { %733 = vmatpush.msrb.mxu1 %v685_v39  ;;  %v830_v39 = vld [vmem:[%s1931_s9 + $0xe8] sm:$0xff] }
  0x5f   : > { %834 = vmatpush.msra.mxu2 %v815_v38  ;;  %898 = vmatpush.msrb.mxu3 %v884_v15 }
  0x60   : > { %734 = vmatpush.msrb.mxu1 %v684_v41  ;;  %v829_v41 = vld [vmem:[%s1931_s9 + $0xe0] sm:$0xff] }
  0x61   : > { %835 = vmatpush.msra.mxu2 %v814_v40 }
  0x62   : > { %735 = vmatpush.msrb.mxu1 %v683_v43  ;;  %v828_v43 = vld [vmem:[%s1931_s9 + $0xd8] sm:$0xff] }
  0x63   : > { %836 = vmatpush.msra.mxu2 %v813_v42 }
  0xc0   : > { %v1663_v56 = vpop.f32.mrf.mxu1 }
  0xc5   : > { %v644_v23 = vpop.f32.mrf.mxu2 }
  0xc6   : > { %654 = vrot.lane.b32.xlu1 %v644_v23, %s1946_s0  ;;  %648 = vrot.lane.b32.xlu0 %v644_v23, %s1947_s26  ;;  %s539_s0 = sadd.s32 4, %s1130_s3  ;;  %s530_s26 = sld [smem:[#allocation5 + %s529_s18]] }
  0xc7   : > { %s540_s6 = sld [smem:[#allocation5 + %s539_s0]]  ;;  %s1980_s3 = smov 96  }
  0xcc   : > { %v531_v17 = vstv %s530_s26 }
  0xcd   : > { %v532_v18 = vsel %vm528_vm7, %v531_v17, %v527_v16  ;;  %v541_v21 = vstv %s540_s6  ;;  %v883_v16 = vld [vmem:[%s1978_s24 + $0x28] sm:$0xff]  ;;  %v882_v17 = vld [vmem:[%s1978_s24 + $0x20] sm:$0xff] }
  0xce   : > { %651 = vrot.lane.b32.xlu0 %v644_v23, %s1949_s19  ;;  %s1976_s19 = sld [smem:[#allocation20_spill]]  ;;  %v537_v20 = vsel %vm533_vm8, %v536_v19, %v532_v18  ;;  %899 = vmatpush.msrb.mxu3 %v883_v16  ;;  %v881_v18 = vld [vmem:[%s1978_s24 + $0x18] sm:$0xff]  ;;  %v880_v19 = vld [vmem:[%s1978_s24 + $0x10] sm:$0xff] }
  0xcf   : > { %v542_v22 = vsel %vm538_vm9, %v541_v21, %v537_v20  ;;  %v879_v20 = vld [vmem:[%s1978_s24 + $0x8] sm:$0xff]  ;;  %v878_v21 = vld [vmem:[%s1978_s24] sm:$0xff] }
  0xd0   : > { %900 = vmatpush.msrb.mxu3 %v882_v17 }
  0xd2   : > { %901 = vmatpush.msrb.mxu3 %v881_v18 }
  0xd4   : > { %v568_v63 = vld [vmem:[%s1976_s19 + $0x38] sm:$0xff]  ;;  %v567_v0 = vld [vmem:[%s1976_s19 + $0x30] sm:$0xff]  ;;  %v566_v1 = vld [vmem:[%s1976_s19 + $0x28] sm:$0xff]  ;;  %902 = vmatpush.msrb.mxu3 %v880_v19 }
  0xd5   : > { %581 = vmatpush.msra.mxu0 %v568_v63  ;;  %v565_v2 = vld [vmem:[%s1976_s19 + $0x20] sm:$0xff]  ;;  %v564_v3 = vld [vmem:[%s1976_s19 + $0x18] sm:$0xff]  ;;  %v563_v4 = vld [vmem:[%s1976_s19 + $0x10] sm:$0xff] }
  0xd6   : > { %v562_v5 = vld [vmem:[%s1976_s19 + $0x8] sm:$0xff]  ;;  %v561_v30 = vld [vmem:[%s1976_s19] sm:$0xff]  ;;  %v819_v63 = vld [vmem:[%s1931_s9 + $0x90] sm:$0xff]  ;;  %903 = vmatpush.msrb.mxu3 %v879_v20 }
  0xd7   : > { %582 = vmatpush.msra.mxu0 %v567_v0 }
  0xd8   : > { %904 = vmatpush.msrb.mxu3 %v878_v21 }
  0xd9   : > { %583 = vmatpush.msra.mxu0 %v566_v1  ;;  %v805_v1 = vld [vmem:[%s1931_s9 + $0x20] sm:$0xff] }
  0xdb   : > { %584 = vmatpush.msra.mxu0 %v565_v2  ;;  %v818_v2 = vld [vmem:[%s1931_s9 + $0x88] sm:$0xff] }
  0xdd   : > { %585 = vmatpush.msra.mxu0 %v564_v3  ;;  %v804_v3 = vld [vmem:[%s1931_s9 + $0x18] sm:$0xff] }
  0xdf   : > { %586 = vmatpush.msra.mxu0 %v563_v4  ;;  %v817_v4 = vld [vmem:[%s1931_s9 + $0x80] sm:$0xff] }
  0xe1   : > { %587 = vmatpush.msra.mxu0 %v562_v5  ;;  %v803_v5 = vld [vmem:[%s1931_s9 + $0x10] sm:$0xff] }
  0xe3   : > { %588 = vmatpush.msra.mxu0 %v561_v30 }
  0xe5   : > { %792 = vmatpush.msrb.mxu0 %v753_v32  ;;  %v594_v32 = vld [vmem:[#allocation3] sm:$0xff] }
 0x138   : > { %v649_v44 = vpop.permute.xlu0 %648  ;;  %v655_v49 = vpop.permute.xlu1 %654 }
 0x139   : > { %v657_v45 = vsel %vm603_vm1, %v644_v23, %v649_v44  ;;  %v546_v23 = vstv %s545_s10  ;;  %v812_v44 = vld [vmem:[%s1931_s9 + $0x58] sm:$0xff] }
 0x13a   : > { %v547_v24 = vsel %vm543_vm10, %v546_v23, %v542_v22  ;;  %837 = vmatpush.msra.mxu2 %v812_v44 }
 0x13b   : > { %v552_v27 = vsel %vm548_vm11, %v551_v25, %v547_v24 }
 0x13c   : > { %v557_v29 = vsel %vm553_vm12, %v556_v28, %v552_v27  ;;  %v1207_v27 = vld [vmem:[%s1934_s12] ss:$0 sm:$0xff] }
 0x13d   : > { %vm558_vm13 = vcmp.eq.s32.totalorder %v515_v26, %v557_v29 }
 0x13e   : > { %v1131_v34 = vsel %vm558_vm13, 1.0, %v1371_v33 }
 0x13f   : > { %1132 = vmatmul.msk.f32.vlgmr.msra.gmra.mxu0 %vm569_vm2, %v1131_v34 }
 0x140   : > { %v652_v48 = vpop.permute.xlu0 %651  ;;  %853 = vmatpush.msra.mxu0 %v832_v35 }
 0x141   : > { %v658_v50 = vsel %vm569_vm2, %v657_v45, %v652_v48  ;;  %v827_v45 = vld [vmem:[%s1931_s9 + $0xd0] sm:$0xff]  ;;  %v810_v48 = vld [vmem:[%s1931_s9 + $0x48] sm:$0xff] }
 0x142   : > { %v660_v51 = vsel %vm659_vm3, %v658_v50, %v655_v49  ;;  %854 = vmatpush.msra.mxu0 %v831_v36  ;;  %v825_v49 = vld [vmem:[%s1931_s9 + $0xc0] sm:$0xff]  ;;  %v824_v50 = vld [vmem:[%s1931_s9 + $0xb8] sm:$0xff] }
 0x143   : > { %v663_v52 = vadd.f32 %v661_v46, %v660_v51  ;;  %v664_v53 = vadd.f32 %v662_v47, %v660_v51  ;;  %v811_v46 = vld [vmem:[%s1931_s9 + $0x50] sm:$0xff]  ;;  %v826_v47 = vld [vmem:[%s1931_s9 + $0xc8] sm:$0xff] }
 0x144   : > { %855 = vmatpush.msra.mxu0 %v830_v39  ;;  %838 = vmatpush.msra.mxu2 %v811_v46  ;;  %v823_v51 = vld [vmem:[%s1931_s9 + $0xb0] sm:$0xff] }
 0x145   : > { %1209 = vtanh.f32 %v663_v52 }
 0x146   : > { %1211 = vtanh.f32 %v664_v53  ;;  %856 = vmatpush.msra.mxu0 %v829_v41  ;;  %839 = vmatpush.msra.mxu2 %v810_v48 }
 0x148   : > { %857 = vmatpush.msra.mxu0 %v828_v43 }
 0x14a   : > { %858 = vmatpush.msra.mxu0 %v827_v45 }
 0x14b   : > { %v1210_v54 = vpop.eup %1209 }
 0x14c   : > { %v1212_v55 = vpop.eup %1211  ;;  %716 = vmatmul.f32.vlgmr.msra.gmra.mxu3 %v1210_v54  ;;  %859 = vmatpush.msra.mxu0 %v826_v47 }
 0x14d   : > { %736 = vmatmul.f32.vlgmr.msrb.gmra.mxu1 %v1212_v55  ;;  %v809_v55 = vld [vmem:[%s1931_s9 + $0x40] sm:$0xff] }
 0x14e   : > { %860 = vmatpush.msra.mxu0 %v825_v49  ;;  %840 = vmatpush.msra.mxu2 %v809_v55  ;;  %v965_v55 = vld [vmem:[%s1935_s13] sm:$0xff] }
 0x150   : > { %861 = vmatpush.msra.mxu0 %v824_v50 }
 0x152   : > { %862 = vmatpush.msra.mxu0 %v823_v51 }
 0x1bc   : > { %v590_v0 = vpop.f32.mrf.mxu0 }
 0x1ca   : > { %v737_v60 = vpop.f32.mrf.mxu1 }
 0x1cf   : > { %v717_v58 = vpop.f32.mrf.mxu3 }
 0x1d0   : > { %v718_v59 = vadd.f32 %v717_v58, %v699_v57  ;;  %v822_v57 = vld [vmem:[%s1931_s9 + $0xa8] sm:$0xff]  ;;  %v808_v58 = vld [vmem:[%s1931_s9 + $0x38] sm:$0xff] }
 0x1d1   : > { %863 = vmatpush.msra.mxu0 %v822_v57  ;;  %841 = vmatpush.msra.mxu2 %v808_v58 }
 0x1d2   : > { %v738_v61 = vadd.f32 %v737_v60, %v718_v59  ;;  %v821_v59 = vld [vmem:[%s1931_s9 + $0xa0] sm:$0xff]  ;;  %v807_v60 = vld [vmem:[%s1931_s9 + $0x30] sm:$0xff] }
 0x1d3   : > { %864 = vmatpush.msra.mxu0 %v821_v59  ;;  %842 = vmatpush.msra.mxu2 %v807_v60 }
 0x1d4   : > { %v741_v62 = vsel %vm740_vm4, %v738_v61, -inf }
 0x1d5   : > { %742 = vmax.xlane.f32.xlu1 %v741_v62  ;;  %v806_v62 = vld [vmem:[%s1931_s9 + $0x28] sm:$0xff] }
 0x1d6   : > { %843 = vmatpush.msra.mxu2 %v806_v62 }
 0x1d8   : > { %844 = vmatpush.msra.mxu2 %v805_v1 }
 0x1da   : > { %845 = vmatpush.msra.mxu2 %v804_v3 }
 0x1dc   : > { %846 = vmatpush.msra.mxu2 %v803_v5 }
 0x248   : > { %v743_v6 = vpop.xlane.xlu1 %742 }
 0x249   : > { %v744_v7 = vsub.f32 %v738_v61, %v743_v6  ;;  %v820_v61 = vld [vmem:[%s1931_s9 + $0x98] sm:$0xff]  ;;  %v802_v6 = vld [vmem:[%s1931_s9 + $0x8] sm:$0xff] }
 0x24a   : > { %865 = vmatpush.msra.mxu0 %v820_v61  ;;  %847 = vmatpush.msra.mxu2 %v802_v6  ;;  %v1208_v61 = vld [vmem:[%s1936_s14] ss:$0 sm:$0xff] }
 0x24b   : > { %v745_v8 = vmul.f32 1.442695, %v744_v7  ;;  %v801_v7 = vld [vmem:[%s1931_s9] sm:$0xff] }
 0x24c   : > { %866 = vmatpush.msra.mxu0 %v819_v63  ;;  %848 = vmatpush.msra.mxu2 %v801_v7 }
 0x24d   : > { %1213 = vpow2.f32 %v745_v8  ;;  %v798_v8 = vld [vmem:[%s1927_s5 + $0x8] sm:$0xff] }
 0x24e   : > { %867 = vmatpush.msra.mxu0 %v818_v2 }
 0x250   : > { %868 = vmatpush.msra.mxu0 %v817_v4 }
 0x253   : > { %v1690_v9 = vpop.eup %1213 }
 0x254   : > { %v747_v10 = vsel %vm740_vm4, %v1690_v9, 0.0 }
 0x255   : > { %748 = vadd.xlane.f32.xlu2 %v747_v10 }
 0x26d   : > { %874 = vrot.lane.b32.xlu2 %v590_v0, %s1977_s23 }
 0x2c8   : > { %v749_v52 = vpop.xlane.xlu2 %748 }
 0x2c9   : > { %1215 = vrcp.f32 %v749_v52  ;;  %v968_v52 = vld [vmem:[%s1935_s13 + $0x18] sm:$0xff] }
 0x2ca   : > { %987 = vmatpush.msra.mxu1 %v968_v52 }
 0x2cf   : > { %v1216_v53 = vpop.eup %1215 }
 0x2d0   : > { %v751_v54 = vmul.f32 %v1216_v53, %v1690_v9  ;;  %v875_v25 = vpop.permute.xlu2 %874  ;;  %v967_v53 = vld [vmem:[%s1935_s13 + $0x10] sm:$0xff] }
 0x2d1   : > { %988 = vmatpush.msra.mxu1 %v967_v53 }
 0x2d2   : > { %1135 = vmatmul.msk.f32.vlgmr.msrb.gmra.mxu2 %vm740_vm4, %v751_v54  ;;  %1136 = vmatmul.msk.f32.vlgmr.msrb.gmra.mxu0 %vm740_vm4, %v751_v54  ;;  %v966_v54 = vld [vmem:[%s1935_s13 + $0x8] sm:$0xff] }
 0x2d3   : > { %989 = vmatpush.msra.mxu1 %v966_v54 }
 0x2d5   : > { %990 = vmatpush.msra.mxu1 %v965_v55 }
 0x34f   : > { %v794_v9 = vpop.f32.mrf.mxu0 }
 0x350   : > { %v800_v10 = vmul.f32 %v798_v8, %v794_v9 }
 0x352   : > { %869 = vmatmul.f32.vlgmr.msra.gmra.mxu0 %v800_v10 }
 0x355   : > { %v774_v12 = vpop.f32.mrf.mxu2 }
 0x356   : > { %v799_v13 = vmul.f32 %v797_v11, %v774_v12 }
 0x358   : > { %849 = vmatmul.f32.vlgmr.msra.gmra.mxu2 %v799_v13 }
 0x3cf   : > { %v870_v22 = vpop.f32.mrf.mxu0 }
 0x3db   : > { %v850_v23 = vpop.f32.mrf.mxu2 }
 0x3dc   : > { %v871_v24 = vadd.f32 %v870_v22, %v850_v23 }
 0x3de   : > { %v877_v26 = vsel %vm603_vm1, %v871_v24, %v875_v25 }
 0x3df   : > { %1137 = vmatmul.msk.f32.vlgmr.msrb.gmra.mxu3 %vm569_vm2, %v877_v26 }
 0x462   : > { %v906_v28 = vpop.f32.mrf.mxu3 }
 0x463   : > { %v907_v29 = vadd.f32 %v906_v28, %v1663_v56 }
 0x465   : > { %v913_v30 = vadd.f32 %v1207_v27, %v907_v29 }
 0x467   : > { %1217 = vtanh.f32 %v913_v30  ;;  %v1138_v33 = vmul.f32 -1.442695, %v913_v30 }
 0x469   : > { %1219 = vpow2.f32 %v1138_v33 }
 0x46d   : > { %v1218_v31 = vpop.eup %1217 }
 0x46e   : > { %940 = vrot.lane.b32.xlu0 %v1218_v31, %s1979_s7 }
 0x46f   : > { %v1220_v34 = vpop.eup %1219 }
 0x470   : > { %v917_v35 = vadd.f32 1.0, %v1220_v34 }
 0x472   : > { %1221 = vrcp.f32 %v917_v35  ;;  %v929_v56 = vand.u32 2147483648, %v917_v35  ;;  %vm923_vm15 = vweird.f32 %v917_v35  ;;  %v927_v41 = vand.u32 2147483647, %v917_v35 }
 0x474   : > { %v930_v43 = vor.u32 1.1754944e-38, %v929_v56  ;;  %vm928_vm3 = vcmp.eq.f32.partialorder %v927_v41, 8.507059e+37 }
 0x476   : > { %935 = vrot.lane.b32.xlu0 %v594_v32, %s1977_s23 }
 0x478   : > { %v1222_v36 = vpop.eup %1221 }
 0x479   : > { %v919_v37 = vmul.f32 %v1222_v36, %v917_v35  ;;  %vm924_vm14 = vweird.f32 %v1222_v36 }
 0x47a   : > { %vm925_vm0 = vmor %vm923_vm15, %vm924_vm14 }
 0x47b   : > { %v920_v38 = vsub.f32 1.0, %v919_v37 }
 0x47d   : > { %v921_v39 = vmul.f32 %v1222_v36, %v920_v38 }
 0x47f   : > { %v922_v40 = vadd.f32 %v1222_v36, %v921_v39 }
 0x481   : > { %v926_v42 = vsel %vm925_vm0, %v1222_v36, %v922_v40 }
 0x482   : > { %v931_v45 = vsel %vm928_vm3, %v930_v43, %v926_v42 }
 0x4e0   : > { %v941_v44 = vpop.permute.xlu0 %940 }
 0x4e1   : > { %v943_v46 = vmul.f32 %v941_v44, %v931_v45 }
 0x4e3   : > { %945 = vrot.lane.b32.xlu0 %v943_v46, %s1977_s23 }
 0x4e8   : > { %v936_v47 = vpop.permute.xlu0 %935 }
 0x4e9   : > { %v938_v48 = vmul.f32 %v936_v47, %v931_v45 }
 0x555   : > { %v946_v49 = vpop.permute.xlu0 %945 }
 0x556   : > { %v948_v50 = vadd.f32 %v946_v49, %v938_v48 }
 0x558   : > { %1223 = vtanh.f32 %v948_v50  ;;  %961 = vrot.lane.b32.xlu1 %v948_v50, %s1980_s3 }
 0x55e   : > { %v1224_v51 = vpop.eup %1223 }
 0x55f   : > { %951 = vrot.lane.b32.xlu2 %v1224_v51, %s1979_s7 }
 0x5b9   : > { %v952_v57 = vpop.permute.xlu2 %951 }
 0x5ba   : > { %v954_v58 = vmul.f32 %v952_v57, %v931_v45 }
 0x5bc   : > { %956 = vrot.lane.b32.xlu0 %v954_v58, %s1977_s23  ;;  %s1981_s23 = scalar_lea.vmem [#allocation6], %s1520_s25 }
 0x5ca   : > { %v962_v59 = vpop.permute.xlu1 %961 }
 0x5cb   : > { %964 = vst.msk [vmem:[#allocation3] sm:$0xff] %vm603_vm1, %v962_v59 }
 0x62e   : > { %v957_v60 = vpop.permute.xlu0 %956 }
 0x62f   : > { %959 = vst.msk [vmem:[#allocation2] sm:$0xff] %vm603_vm1, %v957_v60  ;;  %1139 = vmatmul.msk.f32.vlgmr.msra.gmra.mxu1 %vm603_vm1, %v957_v60 }
 0x6ac   : > { %v992_v62 = vpop.f32.mrf.mxu1 }
 0x6ad   : > { %v993_v63 = vadd.f32 %v1208_v61, %v992_v62 }
 0x6af   : > { %v995_v0 = vsel %vm569_vm2, %v993_v63, -inf }
 0x6b0   : > { %996 = vmax.xlane.f32.xlu2 %v995_v0 }
 0x723   : > { %v997_v1 = vpop.xlane.xlu2 %996 }
 0x724   : > { %v998_v2 = vsub.f32 %v993_v63, %v997_v1 }
 0x726   : > { %v999_v3 = vmul.f32 1.442695, %v998_v2 }
 0x728   : > { %1225 = vpow2.f32 %v999_v3 }
 0x72e   : > { %v1226_v4 = vpop.eup %1225 }
 0x72f   : > { %v1001_v5 = vsel %vm569_vm2, %v1226_v4, 0.0 }
 0x730   : > { %1002 = vadd.xlane.f32.xlu0 %v1001_v5 }
 0x7a3   : > { %v1003_v6 = vpop.xlane.xlu0 %1002 }
 0x7a4   : > { %1227 = vlog2.f32 %v1003_v6 }
 0x7aa   : > { %v1228_v7 = vpop.eup %1227 }
 0x7ab   : > { %v1005_v8 = vmul.f32 0.6931472, %v1228_v7 }
 0x7ad   : > { %v1006_v9 = vadd.f32 %v1005_v8, %v997_v1  ;;  %1012 = sbr.rel (%p1140_p11) target bundleno = 1972 (0x7b4), region = 84 }
 0x7af   : > { %v1007_v10 = vsub.f32 %v993_v63, %v1006_v9 }
 0x7b1   : > { %1008 = vst.msk [vmem:[%s1981_s23] sm:$0xff] %vm569_vm2, %v1007_v10 }
 0x7b2   : > { %1013 = vst.msk [vmem:[#allocation8] sm:$0xff] %vm603_vm1, %v957_v60 }
 0x7b3   : > { %1014 = vst.msk [vmem:[#allocation10] sm:$0xff] %vm603_vm1, %v962_v59 }
 0x7b4 PF: > { %s1042_s7 = sshll.u32 %s1938_s16, 4  ;;  %s1372_s3 = smov [#allocation8]   ;;  %s1043_s7 = int_to_ptr.hbm [resolvable:$true] %s1042_s7 }
 0x7b5   : > { %s1040_s27 = sshll.u32 %s1372_s3, 4  ;;  %s1142_s6 = sshll.u32 %s1488_s11, 3  ;;  %s1041_s27 = int_to_ptr.vmem [resolvable:$true] %s1040_s27 }
 0x7b6   : > { %1151 = dma.vmem_to_hbm [thread:$0]  (%p352_p2), %s1041_s27, 128, %s1043_s7, [#allocation9]  }
 0x7b7   : > { %s1982_s18 = scalar_lea.vmem [#allocation6], %s1520_s25  ;;  %s1026_s1 = scalar_lea.hbm %s1937_s15, %s1142_s6 }
 0x7b8   : > { %s1028_s10 = sshll.u32 %s1982_s18, 4  ;;  %s1030_s21 = sshll.u32 %s1026_s1, 4  ;;  %s1029_s10 = int_to_ptr.vmem [resolvable:$true] %s1028_s10  ;;  %s1031_s21 = int_to_ptr.hbm [resolvable:$true] %s1030_s21 }
 0x7b9   : > { %s1373_s0 = smov [#allocation10]   ;;  %s1983_s23 = sand.u32 1, %s1357_s29  }
 0x7ba   : > { %s1052_s26 = sshll.u32 %s1373_s0, 4  ;;  %s1016_s20 = scalar_lea.sflag [#allocation7], %s1983_s23  ;;  %s1053_s26 = int_to_ptr.vmem [resolvable:$true] %s1052_s26 }
 0x7bb   : > { %s1283_s4 = sshra.s32 %s1031_s21, 4  ;;  %s1289_s27 = scalar_lea.hbm %s1937_s15, 32  ;;  %s1284_s4 = int_to_ptr.hbm [resolvable:$true] %s1283_s4 }
 0x7bc   : > { %s1285_s3 = scalar_lea.hbm %s1284_s4, 8  ;;  %p1290_p1 = scmp.lt.s32.totalorder %s1284_s4, %s1937_s15 }
 0x7bd   : > { %p1286_p12 = scmp.ne.s32.totalorder %s1284_s4, %s1285_s3  ;;  %p1291_p3 = scmp.lt.s32.totalorder %s1289_s27, %s1285_s3 }
 0x7bf   : > { %p1287_p13 = pnand %p1286_p12, %p1507_p5  ;;  %p1292_p4 = por %p1291_p3, %p1290_p1 }
 0x7c1   : > { %p1288_p0 = pneg %p1287_p13 }
 0x7c3   : > { %p1293_p7 = pnand %p1292_p4, %p1288_p0 }
 0x7c5   : > { %1296 = shalt.err (!%p1293_p7)
}
 0x7c6   : > { %1149 = dma.vmem_to_hbm [thread:$0]  (%p1507_p5), %s1029_s10, 128, %s1031_s21, %s1016_s20  }
 0x7c7   : > { %s1054_s1 = sshll.u32 %s1939_s17, 4  ;;  %s1055_s1 = int_to_ptr.hbm [resolvable:$true] %s1054_s1 }
 0x7c8   : > { %1153 = dma.vmem_to_hbm [thread:$0]  (%p352_p2), %s1053_s26, 128, %s1055_s1, [#allocation9]  }
 0x7c9   : > { %1344 = dma.done.wait (%p352_p2), [#allocation9], 256  }
 0x7ca   : > { %1346 = vsyncadd (%p352_p2), [#allocation9], 4294967040 }
 0x7cb PF: > { %s1984_s0 = sld [smem:[#allocation14_spill]]  ;;  %p1167_p8 = scmp.ge.s32.totalorder %s1365_s30, 2 }
 0x7cd   : > { %p1160_p5 = pnand %p1167_p8, %p1511_p6 }
 0x7cf   : > { %p1161_p9 = pneg %p1160_p5 }
 0x7d1   : > { %s1076_s23 = sand.u32 1, %s1984_s0  }
 0x7d2   : > { %s1077_s10 = scalar_lea.sflag [#allocation7], %s1076_s23 }
 0x7d3   : > { %1348 = dma.done.wait (%p1161_p9), %s1077_s10, 128  }
 0x7d4   : > { %1350 = vsyncadd (%p1161_p9), %s1077_s10, 4294967168  ;;  %s1986_s30 = sld [smem:[#allocation16_spill]]  ;;  %s1989_s28 = smov %s1357_s29 }
 0x7d5   : > { %s1987_s21 = sld [smem:[#allocation15_spill]] }
 0x7d6   : > { %s1988_s0 = sld [smem:[#allocation17_spill]] }
 0x7da   : > { %p37_p10 = scmp.ge.s32.totalorder %s1986_s30, 6  }
 0x7db   : > { %s1990_s29 = smov %s1987_s21 }
 0x7dc   :  { %39 = sbr.rel (!%p37_p10) target bundleno = 25 (0x19), region = 132 }
 0x7e1   :  { %1083 = vsyncpa [#allocation7], 1 }
 0x7e2   :  { %1085 = vsyncpa [#allocation7 + $0x1], 1 }
 0x7e3   :  { %1086 = vsyncpa [#allocation9], 1 }

</bundles_post_ra>
